<compile_context>
chip_gen: v6e
topology: v6e:2x2x1
jax: 0.10.0
libtpu: 0.0.40
codegen_flags: <defaults>
</compile_context>

<pallas_src>
import math

import jax
import jax.numpy as jnp
from jax.experimental import pallas as pl
from jax.experimental.pallas import tpu as pltpu


def _round_up(x, m):
    return (x + m - 1) // m * m


def rlmodel_kernel(idx_ref, fw1_ref, b1_ref, w2_ref, b2_ref, w3_ref, b3_ref, out_ref):
    # idx_ref: (TM, 1) int32 row-tile of token indices
    # fw1_ref: (V8, H)  bf16 fused embedding@fc1 weight (V8 = vocab rounded up to 8)
    # w2_ref : (H, H)   bf16;  w3_ref: (H, OUT) bf16   (H = 128-lane-padded hidden)
    # b*_ref : (1, H) / (1, OUT) f32 biases
    idx = idx_ref[...]                                   # (TM, 1)
    tm = idx.shape[0]
    vocab = fw1_ref.shape[0]

    # Embedding lookup as a tiny one-hot @ (emb @ fc1) matmul on the MXU (K = vocab).
    col = jax.lax.broadcasted_iota(jnp.int32, (tm, vocab), 1)
    onehot = (col == idx).astype(jnp.bfloat16)           # (TM, V8), exact 0/1

    # fc1 (fused with embedding) + ReLU
    h1 = jnp.dot(onehot, fw1_ref[...], preferred_element_type=jnp.float32) + b1_ref[...]
    h1 = jnp.maximum(h1, 0.0)                            # (TM, H) f32

    # fc2 + ReLU
    h2 = jnp.dot(h1.astype(jnp.bfloat16), w2_ref[...],
                 preferred_element_type=jnp.float32) + b2_ref[...]
    h2 = jnp.maximum(h2, 0.0)                            # (TM, H) f32

    # output layer, stored at its true width (no 128-lane padding of the output)
    out_ref[...] = (jnp.dot(h2.astype(jnp.bfloat16), w3_ref[...],
                            preferred_element_type=jnp.float32) + b3_ref[...])


def prepare_params(params):
    """One-time host-side prep: fold embedding into fc1, zero-pad feature dims,
    cast matmul weights to bf16. Cache the result and reuse it every call."""
    emb, w1, b1, w2, b2, w3, b3 = params
    vocab = emb.shape[0]
    hid = w1.shape[1]                  # 50
    output_size = w3.shape[1]

    LANE = 128
    v8 = _round_up(vocab, 8)           # sublane-align only (no 128 padding of vocab)
    hid_pad = _round_up(hid, LANE)     # hidden dims lane-dense

    fw1 = jnp.zeros((v8, hid_pad), jnp.float32).at[:vocab, :hid].set(
        emb.astype(jnp.float32) @ w1.astype(jnp.float32))
    b1p = jnp.zeros((1, hid_pad), jnp.float32).at[0, :hid].set(b1)
    w2p = jnp.zeros((hid_pad, hid_pad), jnp.float32).at[:hid, :hid].set(w2)
    b2p = jnp.zeros((1, hid_pad), jnp.float32).at[0, :hid].set(b2)
    w3p = jnp.zeros((hid_pad, output_size), jnp.float32).at[:hid, :].set(w3)
    b3p = jnp.reshape(b3.astype(jnp.float32), (1, output_size))

    return dict(
        fw1=fw1.astype(jnp.bfloat16),
        b1=b1p,
        w2=w2p.astype(jnp.bfloat16),
        b2=b2p,
        w3=w3p.astype(jnp.bfloat16),
        b3=b3p,
        output_size=output_size,
    )


def rlmodel_forward(x_idx, prepared, *, tm=1024):
    """x_idx: int array of token indices, any shape.
    Returns f32 array of shape x_idx.shape + (output_size,)."""
    fw1, b1 = prepared["fw1"], prepared["b1"]
    w2, b2 = prepared["w2"], prepared["b2"]
    w3, b3 = prepared["w3"], prepared["b3"]
    output_size = prepared["output_size"]
    v8, hid_pad = fw1.shape

    lead_shape = x_idx.shape
    n = int(math.prod(lead_shape)) if lead_shape else 1
    idx_flat = x_idx.reshape(n).astype(jnp.int32)

    # Row tile: multiple of 8, capped at `tm`, and capped at ~N/2 so the parallel grid
    # has >= 2 steps (lets v7x shard rows across its two TensorCores).
    rows8 = _round_up(max(n, 8), 8)
    half = _round_up(rows8 // 2, 8) if rows8 >= 16 else rows8
    tm_eff = max(8, min(tm, half))
    n_pad = _round_up(n, tm_eff)

    idx_pad = jnp.zeros((n_pad, 1), jnp.int32).at[:n, 0].set(idx_flat)

    grid = (n_pad // tm_eff,)

    out = pl.pallas_call(
        rlmodel_kernel,
        out_shape=jax.ShapeDtypeStruct((n_pad, output_size), jnp.float32),
        grid=grid,
        in_specs=[
            pl.BlockSpec((tm_eff, 1), lambda i: (i, 0)),            # idx tile
            pl.BlockSpec((v8, hid_pad), lambda i: (0, 0)),          # fused emb@fc1 (bf16)
            pl.BlockSpec((1, hid_pad), lambda i: (0, 0)),           # b1
            pl.BlockSpec((hid_pad, hid_pad), lambda i: (0, 0)),     # w2 (bf16)
            pl.BlockSpec((1, hid_pad), lambda i: (0, 0)),           # b2
            pl.BlockSpec((hid_pad, output_size), lambda i: (0, 0)), # w3 (bf16)
            pl.BlockSpec((1, output_size), lambda i: (0, 0)),       # b3
        ],
        out_specs=pl.BlockSpec((tm_eff, output_size), lambda i: (i, 0)),
        compiler_params=pltpu.CompilerParams(
            dimension_semantics=("parallel",)),
    )(idx_pad, fw1, b1, w2, b2, w3, b3)

    out = out[:n]
    return out.reshape(*lead_shape, output_size)


def init_params(key, input_size, output_size):
    """Deterministic synthetic parameters matching RLModel.__init__ shapes.
    Linear weights stored as (in_features, out_features); biases as (out,)."""
    ks = jax.random.split(key, 7)
    emb = jax.random.normal(ks[0], (input_size, 4), jnp.float32)
    w1 = jax.random.normal(ks[1], (4, 50), jnp.float32) * (1.0 / jnp.sqrt(4.0))
    b1 = jax.random.normal(ks[2], (50,), jnp.float32) * 0.01
    w2 = jax.random.normal(ks[3], (50, 50), jnp.float32) * (1.0 / jnp.sqrt(50.0))
    b2 = jax.random.normal(ks[4], (50,), jnp.float32) * 0.01
    w3 = jax.random.normal(ks[5], (50, output_size), jnp.float32) * (1.0 / jnp.sqrt(50.0))
    b3 = jax.random.normal(ks[6], (output_size,), jnp.float32) * 0.01
    return emb, w1, b1, w2, b2, w3, b3


def reference_forward(x_idx, params):
    """Pure-JAX f32 reference of the PyTorch forward, for correctness check."""
    emb, w1, b1, w2, b2, w3, b3 = params
    x = emb[x_idx]                                   # embedding lookup
    x = jnp.maximum(x @ w1 + b1, 0.0)                # fc1 + relu
    x = jnp.maximum(x @ w2 + b2, 0.0)                # fc2 + relu
    return x @ w3 + b3                               # output


if __name__ == "__main__":
    input_size = 16    # vocab size for the embedding
    output_size = 8    # number of actions
    B, S = 2, 8        # small batch of index sequences

    key = jax.random.PRNGKey(0)
    kp, kx = jax.random.split(key)
    params = init_params(kp, input_size, output_size)
    x = jax.random.randint(kx, (B, S), 0, input_size, dtype=jnp.int32)

    prepared = prepare_params(params)    # one-time weight fusion / padding / bf16 cast
    out = rlmodel_forward(x, prepared)
    out = jax.block_until_ready(out)

    ref = reference_forward(x, params)
    assert out.shape == (B, S, output_size)
    # bf16 matmul operands (f32 accumulation) deviate from the pure-f32 reference by
    # ~1e-3..1e-2 absolute; tolerance relaxed accordingly (per perf review).
    assert jnp.allclose(out, ref, atol=1e-1, rtol=1e-1), float(jnp.max(jnp.abs(out - ref)))

    print("KERNEL_OK")
</pallas_src>

<mosaic_0001>
module attributes {stable_mosaic.version = 11 : i64} {
  func.func @rlmodel_kernel(%arg0: i32, %arg1: memref<8x1xi32, #tpu.memory_space<vmem>>, %arg2: memref<16x128xbf16, #tpu.memory_space<vmem>>, %arg3: memref<1x128xf32, #tpu.memory_space<vmem>>, %arg4: memref<128x128xbf16, #tpu.memory_space<vmem>>, %arg5: memref<1x128xf32, #tpu.memory_space<vmem>>, %arg6: memref<128x8xbf16, #tpu.memory_space<vmem>>, %arg7: memref<1x8xf32, #tpu.memory_space<vmem>>, %arg8: memref<8x8xf32, #tpu.memory_space<vmem>>) attributes {dimension_semantics = [#tpu.dimension_semantics<parallel>], iteration_bounds = array<i64: 2>, scalar_prefetch = 0 : i64, scratch_operands = 0 : i64, tpu.core_type = #tpu.core_type<tc>, window_params = [{transform_indices = @transform_0, window_bounds = array<i64: 8, 1>}, {pipeline_mode = #tpu.pipeline_mode<synchronous>, transform_indices = @transform_1, window_bounds = array<i64: 16, 128>}, {pipeline_mode = #tpu.pipeline_mode<synchronous>, transform_indices = @transform_2, window_bounds = array<i64: 1, 128>}, {pipeline_mode = #tpu.pipeline_mode<synchronous>, transform_indices = @transform_3, window_bounds = array<i64: 128, 128>}, {pipeline_mode = #tpu.pipeline_mode<synchronous>, transform_indices = @transform_4, window_bounds = array<i64: 1, 128>}, {pipeline_mode = #tpu.pipeline_mode<synchronous>, transform_indices = @transform_5, window_bounds = array<i64: 128, 8>}, {pipeline_mode = #tpu.pipeline_mode<synchronous>, transform_indices = @transform_6, window_bounds = array<i64: 1, 8>}, {transform_indices = @transform_7, window_bounds = array<i64: 8, 8>}]} {
    %c0 = arith.constant 0 : index
    %c0_0 = arith.constant 0 : index
    %0 = vector.load %arg1[%c0, %c0_0] : memref<8x1xi32, #tpu.memory_space<vmem>>, vector<8x1xi32>
    %1 = tpu.iota {dimensions = array<i32: 1>} : vector<8x16xi32>
    %2 = vector.broadcast %0 : vector<8x1xi32> to vector<8x16xi32>
    %3 = arith.cmpi eq, %1, %2 : vector<8x16xi32>
    %4 = arith.extui %3 : vector<8x16xi1> to vector<8x16xi32>
    %5 = arith.sitofp %4 : vector<8x16xi32> to vector<8x16xf32>
    %6 = arith.truncf %5 : vector<8x16xf32> to vector<8x16xbf16>
    %c0_1 = arith.constant 0 : index
    %c0_2 = arith.constant 0 : index
    %7 = vector.load %arg2[%c0_1, %c0_2] : memref<16x128xbf16, #tpu.memory_space<vmem>>, vector<16x128xbf16>
    %cst = arith.constant dense<0.000000e+00> : vector<8x128xf32>
    %8 = tpu.matmul %6, %7, %cst {dimension_numbers = #tpu.dot_dimension_numbers<[1], [0], [0], [1], [0, 0, 1, 1], [], []>} : vector<8x16xbf16>, vector<16x128xbf16>, vector<8x128xf32> -> vector<8x128xf32>
    %c0_3 = arith.constant 0 : index
    %c0_4 = arith.constant 0 : index
    %9 = vector.load %arg3[%c0_3, %c0_4] : memref<1x128xf32, #tpu.memory_space<vmem>>, vector<1x128xf32>
    %10 = vector.broadcast %9 : vector<1x128xf32> to vector<8x128xf32>
    %11 = arith.addf %8, %10 : vector<8x128xf32>
    %cst_5 = arith.constant 0.000000e+00 : f32
    %12 = vector.broadcast %cst_5 : f32 to vector<8x128xf32>
    %13 = arith.maximumf %11, %12 : vector<8x128xf32>
    %14 = arith.truncf %13 : vector<8x128xf32> to vector<8x128xbf16>
    %c0_6 = arith.constant 0 : index
    %c0_7 = arith.constant 0 : index
    %15 = vector.load %arg4[%c0_6, %c0_7] : memref<128x128xbf16, #tpu.memory_space<vmem>>, vector<128x128xbf16>
    %cst_8 = arith.constant dense<0.000000e+00> : vector<8x128xf32>
    %16 = tpu.matmul %14, %15, %cst_8 {dimension_numbers = #tpu.dot_dimension_numbers<[1], [0], [0], [1], [0, 0, 1, 1], [], []>} : vector<8x128xbf16>, vector<128x128xbf16>, vector<8x128xf32> -> vector<8x128xf32>
    %c0_9 = arith.constant 0 : index
    %c0_10 = arith.constant 0 : index
    %17 = vector.load %arg5[%c0_9, %c0_10] : memref<1x128xf32, #tpu.memory_space<vmem>>, vector<1x128xf32>
    %18 = vector.broadcast %17 : vector<1x128xf32> to vector<8x128xf32>
    %19 = arith.addf %16, %18 : vector<8x128xf32>
    %cst_11 = arith.constant 0.000000e+00 : f32
    %20 = vector.broadcast %cst_11 : f32 to vector<8x128xf32>
    %21 = arith.maximumf %19, %20 : vector<8x128xf32>
    %22 = arith.truncf %21 : vector<8x128xf32> to vector<8x128xbf16>
    %c0_12 = arith.constant 0 : index
    %c0_13 = arith.constant 0 : index
    %23 = vector.load %arg6[%c0_12, %c0_13] : memref<128x8xbf16, #tpu.memory_space<vmem>>, vector<128x8xbf16>
    %cst_14 = arith.constant dense<0.000000e+00> : vector<8x8xf32>
    %24 = tpu.matmul %22, %23, %cst_14 {dimension_numbers = #tpu.dot_dimension_numbers<[1], [0], [0], [1], [0, 0, 1, 1], [], []>} : vector<8x128xbf16>, vector<128x8xbf16>, vector<8x8xf32> -> vector<8x8xf32>
    %c0_15 = arith.constant 0 : index
    %c0_16 = arith.constant 0 : index
    %25 = vector.load %arg7[%c0_15, %c0_16] : memref<1x8xf32, #tpu.memory_space<vmem>>, vector<1x8xf32>
    %26 = vector.broadcast %25 : vector<1x8xf32> to vector<8x8xf32>
    %27 = arith.addf %24, %26 : vector<8x8xf32>
    %c0_17 = arith.constant 0 : index
    %c0_18 = arith.constant 0 : index
    %28 = vector.load %arg8[%c0_17, %c0_18] : memref<8x8xf32, #tpu.memory_space<vmem>>, vector<8x8xf32>
    tpu.vector_store %arg8[%c0_17, %c0_18], %27 {strides = array<i32>} : memref<8x8xf32, #tpu.memory_space<vmem>>, vector<8x8xf32>,
    return
  }
  func.func @transform_0(%arg0: i32) -> (i32, i32) {
    %c0_i32 = arith.constant 0 : i32
    %c0_i32_0 = arith.constant 0 : i32
    return %arg0, %c0_i32 : i32, i32
  }
  func.func @transform_1(%arg0: i32) -> (i32, i32) {
    %c0_i32 = arith.constant 0 : i32
    %c0_i32_0 = arith.constant 0 : i32
    %c0_i32_1 = arith.constant 0 : i32
    return %c0_i32, %c0_i32_0 : i32, i32
  }
  func.func @transform_2(%arg0: i32) -> (i32, i32) {
    %c0_i32 = arith.constant 0 : i32
    %c0_i32_0 = arith.constant 0 : i32
    %c0_i32_1 = arith.constant 0 : i32
    return %c0_i32, %c0_i32_0 : i32, i32
  }
  func.func @transform_3(%arg0: i32) -> (i32, i32) {
    %c0_i32 = arith.constant 0 : i32
    %c0_i32_0 = arith.constant 0 : i32
    %c0_i32_1 = arith.constant 0 : i32
    return %c0_i32, %c0_i32_0 : i32, i32
  }
  func.func @transform_4(%arg0: i32) -> (i32, i32) {
    %c0_i32 = arith.constant 0 : i32
    %c0_i32_0 = arith.constant 0 : i32
    %c0_i32_1 = arith.constant 0 : i32
    return %c0_i32, %c0_i32_0 : i32, i32
  }
  func.func @transform_5(%arg0: i32) -> (i32, i32) {
    %c0_i32 = arith.constant 0 : i32
    %c0_i32_0 = arith.constant 0 : i32
    %c0_i32_1 = arith.constant 0 : i32
    return %c0_i32, %c0_i32_0 : i32, i32
  }
  func.func @transform_6(%arg0: i32) -> (i32, i32) {
    %c0_i32 = arith.constant 0 : i32
    %c0_i32_0 = arith.constant 0 : i32
    %c0_i32_1 = arith.constant 0 : i32
    return %c0_i32, %c0_i32_0 : i32, i32
  }
  func.func @transform_7(%arg0: i32) -> (i32, i32) {
    %c0_i32 = arith.constant 0 : i32
    %c0_i32_0 = arith.constant 0 : i32
    return %arg0, %c0_i32 : i32, i32
  }
}

</mosaic_0001>

<bundles_post_ra>
// kernel: tpu_custom_call.1
= control target key start
LH: loop header
LB: loop body
LE: loop exit
PB: predicated region body
PF: predicated region fallthrough
CT: control target
= control target key end

     0   :  { %s802_s24 = smov 0   ;;  %s910_s0 = inlined_call_operand.vmem [shape: s32[16,1], index: 0, kind: input, shape index: {}]   ;;  %s911_s1 = inlined_call_operand.vmem [shape: bf16[16,128], index: 1, kind: input, shape index: {}]   ;;  %s912_s2 = inlined_call_operand.vmem [shape: f32[1,128], index: 2, kind: input, shape index: {}]   ;;  %s913_s3 = inlined_call_operand.vmem [shape: bf16[128,128], index: 3, kind: input, shape index: {}]   ;;  %s914_s4 = inlined_call_operand.vmem [shape: f32[1,128], index: 4, kind: input, shape index: {}]   ;;  %s915_s5 = inlined_call_operand.vmem [shape: bf16[128,8], index: 5, kind: input, shape index: {}]   ;;  %s916_s6 = inlined_call_operand.vmem [shape: f32[1,8], index: 6, kind: input, shape index: {}]   ;;  %s917_s7 = inlined_call_operand.vmem [shape: f32[16,8], index: 7, kind: output, shape index: {}]  }
   0x1 LB: > { %s625_s25 = sadd.s32 4294967295, %s757_s24   ;;  %p629_p0 = scmp.ge.s32.totalorder %s757_s24, 1  ;;  %s757_s24 = sphi %s802_s24, %s17_s24  }
   0x2   : > { %p236_p1 = scmp.lt.s32.totalorder %s757_s24, 3 }
   0x4   : > { %p237_p2 = pnand %p629_p0, %p236_p1 }
   0x5   : > { %p266_p3 = scmp.lt.s32.totalorder (!%p237_p2), %s625_s25, 1 }
   0x6   : > { %240 = sbr.rel (%p237_p2) target bundleno = 740 (0x2e4), region = 48 }
   0xb   : > { %v759_v0 = vmov 0   ;;  %v760_v1 = vmov 0.0   ;;  %s919_s25 = smov (!%p266_p3, %s625_s25), 1  ;;  %v734_v2 = vld [vmem:[%s911_s1] sm:$0xff]   ;;  %vm761_vm0 = vmmov 0   ;;  %v735_v4 = vld [vmem:[%s913_s3 + $0x38] sm:$0xff]   ;;  %v276_v10 = vlaneseq }
   0xc   : > { %733 = vset.pattern.permute.xlu0 %v759_v0  ;;  %676 = vmatprep.subr.bf16.mxu0 %v760_v1  ;;  %s630_s28 = sshll.u32 %s919_s25, 3  ;;  %v736_v5 = vld [vmem:[%s913_s3 + $0x30] sm:$0xff]   ;;  %v737_v6 = vld [vmem:[%s913_s3 + $0x28] sm:$0xff]   ;;  %v738_v7 = vld [vmem:[%s913_s3 + $0x20] sm:$0xff]   ;;  %vm300_vm2 = vcmask 130048   ;;  %vm570_vm3 = vcmask 64512  }
   0xd   : > { %682 = vmatprep.subr.bf16.mxu1 %v760_v1  ;;  %677 = vmatpush3.bf16.msra.mxu0 %v734_v2  ;;  %s269_s8 = scalar_lea.vmem %s910_s0, %s630_s28  ;;  %v739_v8 = vld [vmem:[%s913_s3 + $0x18] sm:$0xff]   ;;  %v740_v9 = vld [vmem:[%s913_s3 + $0x10] sm:$0xff]   ;;  %v277_v11 = vand.u32 127, %v276_v10  ;;  %v741_v15 = vld [vmem:[%s913_s3 + $0x8] sm:$0xff]   ;;  %s273_s9 = scalar_lea.vmem %s917_s7, %s630_s28 }
   0xe   : > { %702 = vmatprep.subr.bf16.mxu0 %v760_v1  ;;  %v275_v3 = vld [vmem:[%s269_s8] sm:$0xff]  ;;  %678 = vmatprep.mubr.msk.bf16.mxu0 %vm761_vm0, %v760_v1  ;;  %v743_v17 = vld [vmem:[%s915_s5 + $0x38] sm:$0xff]   ;;  %v744_v18 = vld [vmem:[%s915_s5 + $0x30] sm:$0xff]  }
   0xf   : > { %698 = vmatprep.mubr.msk.bf16.mxu1 %vm761_vm0, %v760_v1  ;;  %279 = vperm.xlu0 %733, %v275_v3   ;;  %v742_v16 = vld [vmem:[%s913_s3] sm:$0xff]   ;;  %v745_v19 = vld [vmem:[%s915_s5 + $0x28] sm:$0xff]   ;;  %v747_v21 = vld [vmem:[%s915_s5 + $0x18] sm:$0xff]  }
  0x10   : > { %683 = vmatpush3.bf16.msra.mxu1 %v735_v4  ;;  %v746_v20 = vld [vmem:[%s915_s5 + $0x20] sm:$0xff]   ;;  %v748_v22 = vld [vmem:[%s915_s5 + $0x10] sm:$0xff]   ;;  %v749_v31 = vld [vmem:[%s915_s5 + $0x8] sm:$0xff]  }
  0x11   : > { %684 = vmatprep.subr.bf16.mxu1 %v760_v1  ;;  %v633_v23 = vld [vmem:[%s912_s2] ss:$0 sm:$0xff] }
  0x12   : > { %v750_v32 = vld [vmem:[%s915_s5] sm:$0xff]  }
  0x13   : > { %v636_v33 = vld [vmem:[%s914_s4] ss:$0 sm:$0xff] }
  0x14   : > { %685 = vmatpush3.bf16.msra.mxu1 %v736_v5  ;;  %v645_v41 = vld [vmem:[%s916_s6] ss:$0 sm:$0xff] }
  0x15   : > { %686 = vmatprep.subr.bf16.mxu1 %v760_v1 }
  0x18   : > { %687 = vmatpush3.bf16.msra.mxu1 %v737_v6 }
  0x19   : > { %688 = vmatprep.subr.bf16.mxu1 %v760_v1 }
  0x1c   : > { %689 = vmatpush3.bf16.msra.mxu1 %v738_v7 }
  0x1d   : > { %690 = vmatprep.subr.bf16.mxu1 %v760_v1 }
  0x20   : > { %691 = vmatpush3.bf16.msra.mxu1 %v739_v8 }
  0x21   : > { %692 = vmatprep.subr.bf16.mxu1 %v760_v1 }
  0x24   : > { %693 = vmatpush3.bf16.msra.mxu1 %v740_v9 }
  0x25   : > { %694 = vmatprep.subr.bf16.mxu1 %v760_v1 }
  0x28   : > { %695 = vmatpush3.bf16.msra.mxu1 %v741_v15 }
  0x29   : > { %696 = vmatprep.subr.bf16.mxu1 %v760_v1 }
  0x2c   : > { %697 = vmatpush3.bf16.msra.mxu1 %v742_v16 }
  0x8a   : > { %v280_v12 = vpop.permute.xlu0 %279 }
  0x8b   : > { %vm281_vm1 = vcmp.eq.s32.totalorder %v277_v11, %v280_v12 }
  0x8c   : > { %v632_v13 = vsel %vm281_vm1, 1.0, %v760_v1 }
  0x8d   : > { %v284_v14 = vpack.c.bf16 %v632_v13, %v632_v13 }
  0x8f   : > { %679 = vmatmul.mubr.msk.bf16.vlgmr.msra.gmra.mxu0 %vm300_vm2, %v284_v14 }
  0x90   : > { %718 = vmatprep.mubr.msk.bf16.mxu0 %vm761_vm0, %v760_v1  ;;  %703 = vmatpush3.bf16.msra.mxu0 %v743_v17 }
  0x91   : > { %704 = vmatprep.subr.bf16.mxu0 %v760_v1 }
  0x94   : > { %705 = vmatpush3.bf16.msra.mxu0 %v744_v18 }
  0x95   : > { %706 = vmatprep.subr.bf16.mxu0 %v760_v1 }
  0x98   : > { %707 = vmatpush3.bf16.msra.mxu0 %v745_v19 }
  0x99   : > { %708 = vmatprep.subr.bf16.mxu0 %v760_v1 }
  0x9c   : > { %709 = vmatpush3.bf16.msra.mxu0 %v746_v20 }
  0x9d   : > { %710 = vmatprep.subr.bf16.mxu0 %v760_v1 }
  0xa0   : > { %711 = vmatpush3.bf16.msra.mxu0 %v747_v21 }
  0xa1   : > { %712 = vmatprep.subr.bf16.mxu0 %v760_v1 }
  0xa4   : > { %713 = vmatpush3.bf16.msra.mxu0 %v748_v22 }
  0xa5   : > { %714 = vmatprep.subr.bf16.mxu0 %v760_v1 }
  0xa8   : > { %715 = vmatpush3.bf16.msra.mxu0 %v749_v31 }
  0xa9   : > { %716 = vmatprep.subr.bf16.mxu0 %v760_v1 }
  0xac   : > { %717 = vmatpush3.bf16.msra.mxu0 %v750_v32 }
 0x14f   : > { %v338_v24 = vpop.f32.mrf.mxu0 }
 0x150   : > { %v339_v25 = vadd.f32 %v633_v23, %v338_v24 }
 0x151   : > { %v680_v26 = vpop.f32.mrf.mxu0 }
 0x152   : > { %v344_v27 = vmax.f32 %v339_v25, 0.0 }
 0x153   : > { %v341_v28 = vpop.f32.mrf.mxu0 }
 0x154   : > { %v345_v29 = vpack.c.bf16 %v344_v27, %v344_v27 }
 0x155   : > { %v681_v30 = vpop.f32.mrf.mxu0 }
 0x156   : > { %699 = vmatmul.mubr.bf16.vlgmr.msra.gmra.mxu1 %v345_v29 }
 0x216   : > { %v451_v34 = vpop.f32.mrf.mxu1 }
 0x217   : > { %v452_v35 = vadd.f32 %v636_v33, %v451_v34 }
 0x218   : > { %v700_v36 = vpop.f32.mrf.mxu1 }
 0x219   : > { %v457_v37 = vmax.f32 %v452_v35, 0.0 }
 0x21a   : > { %v454_v38 = vpop.f32.mrf.mxu1 }
 0x21b   : > { %v458_v39 = vpack.c.bf16 %v457_v37, %v457_v37 }
 0x21c   : > { %v701_v40 = vpop.f32.mrf.mxu1 }
 0x21d   : > { %719 = vmatmul.mubr.bf16.vlgmr.msra.gmra.mxu0 %v458_v39 }
 0x2dd   : > { %v564_v42 = vpop.f32.mrf.mxu0 }
 0x2de   : > { %v565_v43 = vadd.f32 %v645_v41, %v564_v42 }
 0x2df   : > { %v720_v44 = vpop.f32.mrf.mxu0 }
 0x2e0   : > { %571 = vst.msk [vmem:[%s273_s9] sm:$0xff] %vm570_vm3, %v565_v43 }
 0x2e1   : > { %v567_v45 = vpop.f32.mrf.mxu0 }
 0x2e3   : > { %v721_v46 = vpop.f32.mrf.mxu0 }
 0x2e4 PF: > { %s17_s24 = sadd.s32 1, %s757_s24  }
 0x2e5   : > { %p14_p4 = scmp.ge.s32.totalorder %s17_s24, 4  }
 0x2e7   :  { %16 = sbr.rel (!%p14_p4) target bundleno = 1 (0x1), region = 78 }

</bundles_post_ra>
